<compile_context>
chip_gen: v6e
topology: v6e:2x2x1
jax: 0.10.0
libtpu: 0.0.40
codegen_flags: <defaults>
</compile_context>

<pallas_src>
import functools
import math

import jax
import jax.numpy as jnp
from jax.experimental import pallas as pl
from jax.experimental.pallas import tpu as pltpu

NEG = -1e9                      # additive mask value (avoids NaNs vs -inf)
LN_EPS = 1e-5                   # PyTorch LayerNorm default
MXU_DTYPE = jnp.bfloat16        # MXU operand dtype (f32 accumulation everywhere)
_VMEM_LIMIT_BYTES = 48 * 1024 * 1024
_FUSE_WEIGHT_BYTES = 16 * 1024 * 1024   # keep weights resident only below this


def _cparams(*sems):
    return pltpu.CompilerParams(dimension_semantics=sems,
                                vmem_limit_bytes=_VMEM_LIMIT_BYTES)


# ------------------------------ tile helpers --------------------------------

def _tile(dim, target, align):
    """Largest multiple of `align` <= target that evenly divides `dim`,
    else the full dim (single block, always legal)."""
    if dim <= target:
        return dim
    t = (target // align) * align
    while t >= align:
        if dim % t == 0:
            return t
        t -= align
    return dim


def _tile_and_pad(dim, target, align):
    """Return (padded_dim, tile). Pads `dim` up to a multiple of `target`
    when no aligned divisor exists, so the block never degenerates into one
    giant (VMEM-busting) full-dim block (e.g. vocab=50257)."""
    t = _tile(dim, target, align)
    if dim <= target or t != dim:
        return dim, t
    padded = ((dim + target - 1) // target) * target
    return padded, target


# ----------------------------- Pallas kernels -------------------------------

def _matmul_kernel(x_ref, w_ref, b_ref, o_ref, acc_ref, *, relu):
    """Tiled y = x @ w + b (optional ReLU); bf16 operands, f32 accumulator."""
    @pl.when(pl.program_id(2) == 0)
    def _():
        acc_ref[...] = jnp.zeros_like(acc_ref)

    acc_ref[...] += jnp.dot(x_ref[...].astype(MXU_DTYPE),
                            w_ref[...].astype(MXU_DTYPE),
                            preferred_element_type=jnp.float32)

    @pl.when(pl.program_id(2) == pl.num_programs(2) - 1)
    def _():
        y = acc_ref[...] + b_ref[...]
        if relu:
            y = jnp.maximum(y, 0.0)
        o_ref[...] = y.astype(o_ref.dtype)


def pallas_matmul(x, w, b, relu=False):
    """x: (N, K), w: (K, M), b: (1, M) -> (N, M). Tiled over (N, M, K).

    Dims that cannot be tiled cleanly are zero-padded up to a tile multiple
    (exact result; padding stripped from the output)."""
    n, k = x.shape
    m = w.shape[1]
    n_p, tm = _tile_and_pad(n, 512, 8)
    m_p, tn = _tile_and_pad(m, 512, 128)
    k_p, tk = _tile_and_pad(k, 1024, 128)
    if n_p != n or k_p != k:
        x = jnp.pad(x, ((0, n_p - n), (0, k_p - k)))
    if k_p != k or m_p != m:
        w = jnp.pad(w, ((0, k_p - k), (0, m_p - m)))
    if m_p != m:
        b = jnp.pad(b, ((0, 0), (0, m_p - m)))
    out = pl.pallas_call(
        functools.partial(_matmul_kernel, relu=relu),
        out_shape=jax.ShapeDtypeStruct((n_p, m_p), x.dtype),
        grid=(n_p // tm, m_p // tn, k_p // tk),
        in_specs=[
            pl.BlockSpec((tm, tk), lambda i, j, kk: (i, kk)),
            pl.BlockSpec((tk, tn), lambda i, j, kk: (kk, j)),
            pl.BlockSpec((1, tn), lambda i, j, kk: (0, j)),
        ],
        out_specs=pl.BlockSpec((tm, tn), lambda i, j, kk: (i, j)),
        scratch_shapes=[pltpu.VMEM((tm, tn), jnp.float32)],
        compiler_params=_cparams("parallel", "parallel", "arbitrary"),
    )(x, w, b)
    if n_p != n or m_p != m:
        out = out[:n, :m]
    return out


def _add_ln_kernel(x_ref, r_ref, g_ref, b_ref, o_ref, *, eps):
    """out = LayerNorm(x + res) (f32 statistics)."""
    h = x_ref[...].astype(jnp.float32) + r_ref[...].astype(jnp.float32)
    mu = jnp.mean(h, axis=-1, keepdims=True)
    var = jnp.mean(jnp.square(h - mu), axis=-1, keepdims=True)
    o_ref[...] = ((h - mu) * jax.lax.rsqrt(var + eps)
                  * g_ref[...] + b_ref[...]).astype(o_ref.dtype)


def pallas_add_ln(x, res, gamma, beta):
    n, d = x.shape
    tm = _tile(n, 512, 8)
    return pl.pallas_call(
        functools.partial(_add_ln_kernel, eps=LN_EPS),
        out_shape=jax.ShapeDtypeStruct((n, d), x.dtype),
        grid=(n // tm,),
        in_specs=[
            pl.BlockSpec((tm, d), lambda i: (i, 0)),
            pl.BlockSpec((tm, d), lambda i: (i, 0)),
            pl.BlockSpec((1, d), lambda i: (0, 0)),
            pl.BlockSpec((1, d), lambda i: (0, 0)),
        ],
        out_specs=pl.BlockSpec((tm, d), lambda i: (i, 0)),
        compiler_params=_cparams("parallel"),
    )(x, res, gamma, beta)


def _linear_add_ln_kernel(x_ref, w_ref, b_ref, r_ref, g_ref, bb_ref, o_ref,
                          *, eps):
    """out = LayerNorm(x @ w + b + res) fused epilogue (weights resident)."""
    y = jnp.dot(x_ref[...].astype(MXU_DTYPE), w_ref[...].astype(MXU_DTYPE),
                preferred_element_type=jnp.float32) + b_ref[...]
    h = y + r_ref[...]
    mu = jnp.mean(h, axis=-1, keepdims=True)
    var = jnp.mean(jnp.square(h - mu), axis=-1, keepdims=True)
    o_ref[...] = ((h - mu) * jax.lax.rsqrt(var + eps)
                  * g_ref[...] + bb_ref[...]).astype(o_ref.dtype)


def pallas_linear_add_ln(x, w, b, res, gamma, beta):
    """x: (N, Din), w: (Din, Dout), res: (N, Dout). Row-tiled fused kernel;
    falls back to streamed matmul + add-LN when weights exceed the VMEM budget."""
    n, din = x.shape
    dout = w.shape[1]
    if din * dout * x.dtype.itemsize > _FUSE_WEIGHT_BYTES:
        y = pallas_matmul(x, w, b)
        return pallas_add_ln(y, res, gamma, beta)
    tm = _tile(n, 256, 8)
    return pl.pallas_call(
        functools.partial(_linear_add_ln_kernel, eps=LN_EPS),
        out_shape=jax.ShapeDtypeStruct((n, dout), x.dtype),
        grid=(n // tm,),
        in_specs=[
            pl.BlockSpec((tm, din), lambda i: (i, 0)),
            pl.BlockSpec((din, dout), lambda i: (0, 0)),
            pl.BlockSpec((1, dout), lambda i: (0, 0)),
            pl.BlockSpec((tm, dout), lambda i: (i, 0)),
            pl.BlockSpec((1, dout), lambda i: (0, 0)),
            pl.BlockSpec((1, dout), lambda i: (0, 0)),
        ],
        out_specs=pl.BlockSpec((tm, dout), lambda i: (i, 0)),
        compiler_params=_cparams("parallel"),
    )(x, w, b, res, gamma, beta)


def _ffn_add_ln_kernel(x_ref, w1_ref, b1_ref, w2_ref, b2_ref, g_ref, bb_ref,
                       o_ref, *, eps):
    """out = LayerNorm(x + ReLU(x@w1+b1)@w2 + b2) fully fused in VMEM."""
    x = x_ref[...]
    h = jnp.maximum(
        jnp.dot(x.astype(MXU_DTYPE), w1_ref[...].astype(MXU_DTYPE),
                preferred_element_type=jnp.float32) + b1_ref[...], 0.0)
    y = jnp.dot(h.astype(MXU_DTYPE), w2_ref[...].astype(MXU_DTYPE),
                preferred_element_type=jnp.float32) + b2_ref[...]
    z = y + x
    mu = jnp.mean(z, axis=-1, keepdims=True)
    var = jnp.mean(jnp.square(z - mu), axis=-1, keepdims=True)
    o_ref[...] = ((z - mu) * jax.lax.rsqrt(var + eps)
                  * g_ref[...] + bb_ref[...]).astype(o_ref.dtype)


def pallas_ffn_add_ln(x, w1, b1, w2, b2, gamma, beta):
    """x: (N, D) -> (N, D). Fused FFN+residual+LN when w1/w2 fit the VMEM
    budget; otherwise streams w1/w2 through the tiled matmul (K/N tiled)."""
    n, d = x.shape
    ff = w1.shape[1]
    if 2 * d * ff * x.dtype.itemsize > _FUSE_WEIGHT_BYTES:
        h = pallas_matmul(x, w1, b1, relu=True)
        y = pallas_matmul(h, w2, b2)
        return pallas_add_ln(y, x, gamma, beta)
    tm = _tile(n, 256, 8)
    return pl.pallas_call(
        functools.partial(_ffn_add_ln_kernel, eps=LN_EPS),
        out_shape=jax.ShapeDtypeStruct((n, d), x.dtype),
        grid=(n // tm,),
        in_specs=[
            pl.BlockSpec((tm, d), lambda i: (i, 0)),
            pl.BlockSpec((d, ff), lambda i: (0, 0)),
            pl.BlockSpec((1, ff), lambda i: (0, 0)),
            pl.BlockSpec((ff, d), lambda i: (0, 0)),
            pl.BlockSpec((1, d), lambda i: (0, 0)),
            pl.BlockSpec((1, d), lambda i: (0, 0)),
            pl.BlockSpec((1, d), lambda i: (0, 0)),
        ],
        out_specs=pl.BlockSpec((tm, d), lambda i: (i, 0)),
        compiler_params=_cparams("parallel"),
    )(x, w1, b1, w2, b2, gamma, beta)


def _mha_kernel(q_ref, kv_ref, kpb_ref, *rest, nhead, d, k_off, scale,
                has_mask):
    """One (batch, q-tile) step of multi-head attention, all heads unrolled.

    q_ref:  (1, tq, Wq) — first d columns are Q (Wq may be 3D for fused qkv)
    kv_ref: (1, Sk, Wkv) — K at [k_off:k_off+d], V at [k_off+d:k_off+2d]
    kpb_ref:(1, 1, Sk) additive key-padding bias
    rest:   optional (tq, Sk) additive attn mask, then the (1, tq, d) output.
    """
    if has_mask:
        am_ref, o_ref = rest
    else:
        (o_ref,) = rest

    q_all = q_ref[0]                              # (tq, Wq) f32
    kv = kv_ref[0]                                # (Sk, Wkv) f32
    bias = kpb_ref[0]                             # (1, Sk) f32
    if has_mask:
        bias = bias + am_ref[...]                 # (tq, Sk)

    dh = d // nhead
    q = (q_all[:, :d] * scale).astype(MXU_DTYPE)  # fold 1/sqrt(dh) into Q
    for h in range(nhead):                        # static unroll over heads
        qs = q[:, h * dh:(h + 1) * dh]
        ks = kv[:, k_off + h * dh:k_off + (h + 1) * dh].astype(MXU_DTYPE)
        vs = kv[:, k_off + d + h * dh:k_off + d + (h + 1) * dh].astype(MXU_DTYPE)
        # contract last dims: no explicit (Sk, dh) transpose on the XLU
        s = jax.lax.dot_general(qs, ks, (((1,), (1,)), ((), ())),
                                preferred_element_type=jnp.float32)
        s = s + bias
        s = s - jnp.max(s, axis=-1, keepdims=True)
        p = jnp.exp(s)
        p = p * pl.reciprocal(jnp.sum(p, axis=-1, keepdims=True), approx=True)
        o_h = jnp.dot(p.astype(MXU_DTYPE), vs,
                      preferred_element_type=jnp.float32)
        o_ref[0, :, h * dh:(h + 1) * dh] = o_h.astype(o_ref.dtype)


def pallas_attention(q_arr, kv_arr, kp_bias, attn_mask, *, nhead, d, k_off):
    """q_arr: (B, Sq, Wq), kv_arr: (B, Sk, Wkv), kp_bias: (B, 1, Sk),
    attn_mask: (Sq, Sk) additive or None. Grid = (batch, q_tiles)."""
    b, sq, qw = q_arr.shape
    sk, kvw = kv_arr.shape[1], kv_arr.shape[2]
    dh = d // nhead
    tq = _tile(sq, 256, 8)
    has_mask = attn_mask is not None

    in_specs = [
        pl.BlockSpec((1, tq, qw), lambda bi, qi: (bi, qi, 0)),
        pl.BlockSpec((1, sk, kvw), lambda bi, qi: (bi, 0, 0)),
        pl.BlockSpec((1, 1, sk), lambda bi, qi: (bi, 0, 0)),
    ]
    args = [q_arr, kv_arr, kp_bias]
    if has_mask:
        in_specs.append(pl.BlockSpec((tq, sk), lambda bi, qi: (qi, 0)))
        args.append(attn_mask)

    return pl.pallas_call(
        functools.partial(_mha_kernel, nhead=nhead, d=d, k_off=k_off,
                          scale=1.0 / math.sqrt(dh), has_mask=has_mask),
        out_shape=jax.ShapeDtypeStruct((b, sq, d), q_arr.dtype),
        grid=(b, sq // tq),
        in_specs=in_specs,
        out_specs=pl.BlockSpec((1, tq, d), lambda bi, qi: (bi, qi, 0)),
        compiler_params=_cparams("parallel", "parallel"),
    )(*args)


# ------------------------------ model pieces --------------------------------

def encoder_layer(x, p, kp_bias, nhead):
    b, s, d = x.shape
    x2d = x.reshape(b * s, d)
    # fused QKV projection; the (B,S,3D) tensor goes straight to attention
    qkv = pallas_matmul(x2d, p["sa"]["w_qkv"], p["sa"]["b_qkv"]).reshape(b, s, 3 * d)
    attn = pallas_attention(qkv, qkv, kp_bias, None, nhead=nhead, d=d, k_off=d)
    x2 = pallas_linear_add_ln(attn.reshape(b * s, d), p["sa"]["wo"],
                              p["sa"]["bo"], x2d, p["ln1_g"], p["ln1_b"])
    x3 = pallas_ffn_add_ln(x2, p["w1"], p["b1"], p["w2"], p["b2"],
                           p["ln2_g"], p["ln2_b"])
    return x3.reshape(b, s, d)


def decoder_layer(y, memory, p, tgt_kp_bias, tgt_mask, mem_kp_bias, nhead):
    b, st, d = y.shape
    ss = memory.shape[1]
    y2d = y.reshape(b * st, d)

    # self-attention (fused QKV) + out-proj + add + LN
    qkv = pallas_matmul(y2d, p["sa"]["w_qkv"], p["sa"]["b_qkv"]).reshape(b, st, 3 * d)
    sa = pallas_attention(qkv, qkv, tgt_kp_bias, tgt_mask,
                          nhead=nhead, d=d, k_off=d)
    y2 = pallas_linear_add_ln(sa.reshape(b * st, d), p["sa"]["wo"],
                              p["sa"]["bo"], y2d, p["ln1_g"], p["ln1_b"])

    # cross-attention (fused KV projection of memory) + out-proj + add + LN
    q = pallas_matmul(y2, p["ca"]["wq"], p["ca"]["bq"]).reshape(b, st, d)
    kv = pallas_matmul(memory.reshape(b * ss, d), p["ca"]["w_kv"],
                       p["ca"]["b_kv"]).reshape(b, ss, 2 * d)
    ca = pallas_attention(q, kv, mem_kp_bias, None, nhead=nhead, d=d, k_off=0)
    y3 = pallas_linear_add_ln(ca.reshape(b * st, d), p["ca"]["wo"],
                              p["ca"]["bo"], y2, p["ln2_g"], p["ln2_b"])

    # feed-forward + add + LN
    y4 = pallas_ffn_add_ln(y3, p["w1"], p["b1"], p["w2"], p["b2"],
                           p["ln3_g"], p["ln3_b"])
    return y4.reshape(b, st, d)


def positional_encoding_table(max_len, d_model):
    pos = jnp.arange(max_len, dtype=jnp.float32)[:, None]
    div = jnp.exp(jnp.arange(0, d_model, 2, dtype=jnp.float32)
                  * (-math.log(10000.0) / d_model))
    pe = jnp.zeros((max_len, d_model), jnp.float32)
    pe = pe.at[:, 0::2].set(jnp.sin(pos * div))
    pe = pe.at[:, 1::2].set(jnp.cos(pos * div))
    return pe


def summary_transformer_forward(params, cfg, src, tgt, src_attention_mask,
                                tgt_attention_mask, src_key_padding_mask,
                                tgt_key_padding_mask):
    d, nhead = cfg["d_model"], cfg["nhead"]
    b, ss = src.shape
    st = tgt.shape[1]

    # GloveEmbedding lookup (glue) -> (B, S, D), kept batch-first throughout
    src_emb = jnp.take(params["embedding"], src, axis=0)
    tgt_emb = jnp.take(params["embedding"], tgt, axis=0)

    # positional encoding (dropout = identity at inference)
    pe = params["pos_enc"]
    src_emb = src_emb + pe[:ss][None, :, :]
    tgt_emb = tgt_emb + pe[:st][None, :, :]

    # compact additive pad biases; full (B,1,Sq,Sk) bias never hits HBM and
    # the all-zero encoder / cross attn-masks are simply not passed at all.
    src_kp_bias = jnp.where(src_key_padding_mask, NEG, 0.0
                            ).astype(jnp.float32)[:, None, :]   # (B,1,Ss)
    tgt_kp_bias = jnp.where(tgt_key_padding_mask, NEG, 0.0
                            ).astype(jnp.float32)[:, None, :]   # (B,1,St)
    dec_self_mask = (tgt_attention_mask.astype(jnp.float32)
                     if tgt_attention_mask is not None else None)
    del src_attention_mask  # reference forward passes mask=None to encoder

    # encoder
    x = src_emb
    for lp in params["encoder_layers"]:
        x = encoder_layer(x, lp, src_kp_bias, nhead)
    memory = x

    # decoder
    y = tgt_emb
    for lp in params["decoder_layers"]:
        y = decoder_layer(y, memory, lp, tgt_kp_bias, dec_self_mask,
                          src_kp_bias, nhead)

    # transpose the small d-sized activations (not vocab-sized logits), then
    # let the tiled generator matmul emit logits already in (St, B, V).
    y_sb = jnp.transpose(y, (1, 0, 2)).reshape(st * b, d)
    out = pallas_matmul(y_sb, params["gen_w"], params["gen_b"])
    return out.reshape(st, b, -1)                 # (tgt_seq, batch, vocab)


# ------------------------------ parameter init -------------------------------

def _dense(key, din, dout, scale=0.02):
    return scale * jax.random.normal(key, (din, dout), jnp.float32)


def _init_self_attn(key, d):
    k1, k2 = jax.random.split(key)
    return {
        "w_qkv": _dense(k1, d, 3 * d), "b_qkv": jnp.zeros((1, 3 * d), jnp.float32),
        "wo": _dense(k2, d, d), "bo": jnp.zeros((1, d), jnp.float32),
    }


def _init_cross_attn(key, d):
    k1, k2, k3 = jax.random.split(key, 3)
    return {
        "wq": _dense(k1, d, d), "bq": jnp.zeros((1, d), jnp.float32),
        "w_kv": _dense(k2, d, 2 * d), "b_kv": jnp.zeros((1, 2 * d), jnp.float32),
        "wo": _dense(k3, d, d), "bo": jnp.zeros((1, d), jnp.float32),
    }


def _init_encoder_layer(key, d, ff):
    ks = jax.random.split(key, 3)
    return {
        "sa": _init_self_attn(ks[0], d),
        "w1": _dense(ks[1], d, ff), "b1": jnp.zeros((1, ff), jnp.float32),
        "w2": _dense(ks[2], ff, d), "b2": jnp.zeros((1, d), jnp.float32),
        "ln1_g": jnp.ones((1, d), jnp.float32), "ln1_b": jnp.zeros((1, d), jnp.float32),
        "ln2_g": jnp.ones((1, d), jnp.float32), "ln2_b": jnp.zeros((1, d), jnp.float32),
    }


def _init_decoder_layer(key, d, ff):
    ks = jax.random.split(key, 4)
    return {
        "sa": _init_self_attn(ks[0], d),
        "ca": _init_cross_attn(ks[1], d),
        "w1": _dense(ks[2], d, ff), "b1": jnp.zeros((1, ff), jnp.float32),
        "w2": _dense(ks[3], ff, d), "b2": jnp.zeros((1, d), jnp.float32),
        "ln1_g": jnp.ones((1, d), jnp.float32), "ln1_b": jnp.zeros((1, d), jnp.float32),
        "ln2_g": jnp.ones((1, d), jnp.float32), "ln2_b": jnp.zeros((1, d), jnp.float32),
        "ln3_g": jnp.ones((1, d), jnp.float32), "ln3_b": jnp.zeros((1, d), jnp.float32),
    }


def init_params(key, vocab, d, n_enc, n_dec, ff, max_len):
    keys = jax.random.split(key, 2 + n_enc + n_dec)
    return {
        "embedding": 0.1 * jax.random.normal(keys[0], (vocab, d), jnp.float32),
        "pos_enc": positional_encoding_table(max_len, d),
        "encoder_layers": [_init_encoder_layer(keys[2 + i], d, ff)
                           for i in range(n_enc)],
        "decoder_layers": [_init_decoder_layer(keys[2 + n_enc + i], d, ff)
                           for i in range(n_dec)],
        "gen_w": _dense(keys[1], d, vocab),
        "gen_b": jnp.zeros((1, vocab), jnp.float32),
    }


# ---------------------------------- main -------------------------------------

if __name__ == "__main__":
    cfg = dict(vocab_size=64, d_model=32, nhead=4, num_encoder_layers=2,
               num_decoder_layers=2, dim_feedforward=64, max_seq_length=16)
    B, S_SRC, S_TGT = 2, 8, 8

    params = init_params(jax.random.PRNGKey(0), cfg["vocab_size"],
                         cfg["d_model"], cfg["num_encoder_layers"],
                         cfg["num_decoder_layers"], cfg["dim_feedforward"],
                         cfg["max_seq_length"])

    k1, k2 = jax.random.split(jax.random.PRNGKey(0), 2)
    src = jax.random.randint(k1, (B, S_SRC), 0, cfg["vocab_size"], jnp.int32)
    tgt = jax.random.randint(k2, (B, S_TGT), 0, cfg["vocab_size"], jnp.int32)

    # key_padding_mask: True = padding token (ignored by attention)
    src_key_padding_mask = jnp.array(
        [[False] * S_SRC,
         [False] * (S_SRC - 2) + [True] * 2], dtype=bool)
    tgt_key_padding_mask = jnp.zeros((B, S_TGT), dtype=bool)

    # causal mask for decoder self-attention (square subsequent mask)
    causal = jnp.where(jnp.triu(jnp.ones((S_TGT, S_TGT)), k=1) == 1, NEG, 0.0)
    src_attention_mask = None  # reference forward passes mask=None to encoder

    out = summary_transformer_forward(
        params, cfg, src, tgt, src_attention_mask, causal,
        src_key_padding_mask, tgt_key_padding_mask)
    out = jax.block_until_ready(out)

    assert out.shape == (S_TGT, B, cfg["vocab_size"])
    assert bool(jnp.all(jnp.isfinite(out)))
    print("KERNEL_OK")
</pallas_src>

<mosaic_0001>
module attributes {stable_mosaic.version = 11 : i64} {
  func.func @_matmul_kernel(%arg0: i32, %arg1: i32, %arg2: i32, %arg3: memref<16x32xf32, #tpu.memory_space<vmem>>, %arg4: memref<32x96xf32, #tpu.memory_space<vmem>>, %arg5: memref<1x96xf32, #tpu.memory_space<vmem>>, %arg6: memref<16x96xf32, #tpu.memory_space<vmem>>, %arg7: memref<16x96xf32, #tpu.memory_space<vmem>>) attributes {dimension_semantics = [#tpu.dimension_semantics<parallel>, #tpu.dimension_semantics<parallel>, #tpu.dimension_semantics<arbitrary>], iteration_bounds = array<i64: 1, 1, 1>, scalar_prefetch = 0 : i64, scratch_operands = 1 : i64, tpu.core_type = #tpu.core_type<tc>, window_params = [{transform_indices = @transform_0, window_bounds = array<i64: 16, 32>}, {transform_indices = @transform_1, window_bounds = array<i64: 32, 96>}, {transform_indices = @transform_2, window_bounds = array<i64: 1, 96>}, {transform_indices = @transform_3, window_bounds = array<i64: 16, 96>}]} {
    %c0_i32 = arith.constant 0 : i32
    %0 = arith.cmpi eq, %arg2, %c0_i32 : i32
    %1 = arith.extui %0 : i1 to i32
    %c0_i32_0 = arith.constant 0 : i32
    %2 = arith.cmpi ne, %1, %c0_i32_0 : i32
    scf.if %2 {
      %cst_10 = arith.constant 0.000000e+00 : f32
      %14 = vector.broadcast %cst_10 : f32 to vector<16x96xf32>
      %c0_11 = arith.constant 0 : index
      %c0_12 = arith.constant 0 : index
      %15 = vector.load %arg7[%c0_11, %c0_12] : memref<16x96xf32, #tpu.memory_space<vmem>>, vector<16x96xf32>
      tpu.vector_store %arg7[%c0_11, %c0_12], %14 {strides = array<i32>} : memref<16x96xf32, #tpu.memory_space<vmem>>, vector<16x96xf32>,
    } else {
    }
    %c0 = arith.constant 0 : index
    %c0_1 = arith.constant 0 : index
    %3 = vector.load %arg7[%c0, %c0_1] : memref<16x96xf32, #tpu.memory_space<vmem>>, vector<16x96xf32>
    %c0_2 = arith.constant 0 : index
    %c0_3 = arith.constant 0 : index
    %4 = vector.load %arg3[%c0_2, %c0_3] : memref<16x32xf32, #tpu.memory_space<vmem>>, vector<16x32xf32>
    %5 = arith.truncf %4 : vector<16x32xf32> to vector<16x32xbf16>
    %c0_4 = arith.constant 0 : index
    %c0_5 = arith.constant 0 : index
    %6 = vector.load %arg4[%c0_4, %c0_5] : memref<32x96xf32, #tpu.memory_space<vmem>>, vector<32x96xf32>
    %7 = arith.truncf %6 : vector<32x96xf32> to vector<32x96xbf16>
    %cst = arith.constant dense<0.000000e+00> : vector<16x96xf32>
    %8 = tpu.matmul %5, %7, %cst {dimension_numbers = #tpu.dot_dimension_numbers<[1], [0], [0], [1], [0, 0, 1, 1], [], []>} : vector<16x32xbf16>, vector<32x96xbf16>, vector<16x96xf32> -> vector<16x96xf32>
    %9 = arith.addf %3, %8 : vector<16x96xf32>
    %c0_6 = arith.constant 0 : index
    %c0_7 = arith.constant 0 : index
    %10 = vector.load %arg7[%c0_6, %c0_7] : memref<16x96xf32, #tpu.memory_space<vmem>>, vector<16x96xf32>
    tpu.vector_store %arg7[%c0_6, %c0_7], %9 {strides = array<i32>} : memref<16x96xf32, #tpu.memory_space<vmem>>, vector<16x96xf32>,
    %c0_i32_8 = arith.constant 0 : i32
    %11 = arith.cmpi eq, %arg2, %c0_i32_8 : i32
    %12 = arith.extui %11 : i1 to i32
    %c0_i32_9 = arith.constant 0 : i32
    %13 = arith.cmpi ne, %12, %c0_i32_9 : i32
    scf.if %13 {
      %c0_10 = arith.constant 0 : index
      %c0_11 = arith.constant 0 : index
      %14 = vector.load %arg7[%c0_10, %c0_11] : memref<16x96xf32, #tpu.memory_space<vmem>>, vector<16x96xf32>
      %c0_12 = arith.constant 0 : index
      %c0_13 = arith.constant 0 : index
      %15 = vector.load %arg5[%c0_12, %c0_13] : memref<1x96xf32, #tpu.memory_space<vmem>>, vector<1x96xf32>
      %16 = vector.broadcast %15 : vector<1x96xf32> to vector<16x96xf32>
      %17 = arith.addf %14, %16 : vector<16x96xf32>
      %c0_14 = arith.constant 0 : index
      %c0_15 = arith.constant 0 : index
      %18 = vector.load %arg6[%c0_14, %c0_15] : memref<16x96xf32, #tpu.memory_space<vmem>>, vector<16x96xf32>
      tpu.vector_store %arg6[%c0_14, %c0_15], %17 {strides = array<i32>} : memref<16x96xf32, #tpu.memory_space<vmem>>, vector<16x96xf32>,
    } else {
    }
    return
  }
  func.func @transform_0(%arg0: i32, %arg1: i32, %arg2: i32) -> (i32, i32) {
    %c0_i32 = arith.constant 0 : i32
    return %arg0, %arg2 : i32, i32
  }
  func.func @transform_1(%arg0: i32, %arg1: i32, %arg2: i32) -> (i32, i32) {
    %c0_i32 = arith.constant 0 : i32
    return %arg2, %arg1 : i32, i32
  }
  func.func @transform_2(%arg0: i32, %arg1: i32, %arg2: i32) -> (i32, i32) {
    %c0_i32 = arith.constant 0 : i32
    %c0_i32_0 = arith.constant 0 : i32
    return %c0_i32, %arg1 : i32, i32
  }
  func.func @transform_3(%arg0: i32, %arg1: i32, %arg2: i32) -> (i32, i32) {
    %c0_i32 = arith.constant 0 : i32
    return %arg0, %arg1 : i32, i32
  }
}

</mosaic_0001>

<bundles_post_ra>
// kernel: tpu_custom_call.1
= control target key start
LH: loop header
LB: loop body
LE: loop exit
PB: predicated region body
PF: predicated region fallthrough
CT: control target
= control target key end

     0   :  { %8 = vsyncpa [#allocation4], 0  ;;  %s286_s0 = inlined_call_operand.hbm [shape: f32[16,32], index: 0, kind: input, shape index: {}]   ;;  %s287_s1 = inlined_call_operand.hbm [shape: f32[32,96], index: 1, kind: input, shape index: {}]   ;;  %s288_s2 = inlined_call_operand.vmem [shape: f32[1,96], index: 2, kind: input, shape index: {}]   ;;  %s289_s3 = inlined_call_operand.hbm [shape: f32[16,96], index: 3, kind: output, shape index: {}]  }
   0x1   :  { %9 = vsyncpa [#allocation7], 0 }
   0x2   :  { %10 = vsyncpa [#allocation5], 0  ;;  %s232_s12 = smov [#allocation3]  }
   0x3   :  { %s16_s13 = sshll.u32 %s232_s12, 4  ;;  %s17_s13 = int_to_ptr.vmem [resolvable:$true] %s16_s13 }
   0x4   :  { %s174_s14 = scalar_lea.vmem %s17_s13, 256  ;;  %p179_p1 = scmp.lt.s32.totalorder %s17_s13, %s17_s13 }
   0x5   :  { %p175_p0 = scmp.ne.s32.totalorder %s17_s13, %s174_s14  ;;  %p180_p2 = scmp.lt.s32.totalorder %s174_s14, %s174_s14 }
   0x7   :  { %p181_p3 = por %p180_p2, %p179_p1 }
   0x9   :  { %p182_p4 = pnand %p181_p3, %p175_p0 }
   0xb   :  { %185 = shalt.err (!%p182_p4)
}
   0xc   :  { %s233_s15 = smov 128   ;;  %s234_s16 = smov 8  }
   0xd   :  { %22 = dma.hbm_to_vmem [thread:$0]  %s286_s0, 256, %s17_s13, [#allocation4], %s233_s15, %s233_s15, %s234_s16  }
   0xe   :  { %s235_s19 = smov [#allocation6]  }
   0xf   :  { %s28_s20 = sshll.u32 %s235_s19, 4  ;;  %s29_s20 = int_to_ptr.vmem [resolvable:$true] %s28_s20 }
  0x10   :  { %s194_s21 = scalar_lea.vmem %s29_s20, 512  ;;  %p199_p6 = scmp.lt.s32.totalorder %s29_s20, %s29_s20 }
  0x11   :  { %p195_p5 = scmp.ne.s32.totalorder %s29_s20, %s194_s21  ;;  %p200_p7 = scmp.lt.s32.totalorder %s194_s21, %s194_s21 }
  0x13   :  { %p201_p8 = por %p200_p7, %p199_p6 }
  0x15   :  { %p202_p9 = pnand %p201_p8, %p195_p5 }
  0x17   :  { %205 = shalt.err (!%p202_p9)
}
  0x18   :  { %34 = dma.hbm_to_vmem [thread:$0]  %s287_s1, 512, %s29_s20, [#allocation7], %s233_s15, %s233_s15, %s234_s16  }
  0x19   :  { %226 = dma.done.wait [#allocation4], 256  }
  0x1a   :  { %227 = vsyncadd [#allocation4], 4294967040 }
  0x1b   :  { %228 = dma.done.wait [#allocation7], 512  }
  0x1c   :  { %229 = vsyncadd [#allocation7], 4294966784  ;;  %vm48_vm0 = vcmask 785408   ;;  %v236_v0 = vmov 0.0   ;;  %vm237_vm1 = vmmov 0   ;;  %v58_v1 = vld [vmem:[#allocation6 + $0x10] sm:$0xff] }
  0x1d   :  { %49 = vst.msk [vmem:[#allocation2] sm:$0xff] %vm48_vm0, %v236_v0  ;;  %50 = vst.msk [vmem:[#allocation2 + $0x8] sm:$0xff] %vm48_vm0, %v236_v0  ;;  %151 = vmatprep.subr.bf16.mxu0 %v236_v0  ;;  %155 = vmatprep.mubr.msk.bf16.mxu0 %vm237_vm1, %v236_v0  ;;  %v59_v2 = vld [vmem:[#allocation6 + $0x18] sm:$0xff]  ;;  %v56_v3 = vld [vmem:[#allocation6] sm:$0xff]  ;;  %vm62_vm2 = vcmask 261120   ;;  %s238_s24 = smov [#allocation8]  }
  0x1e   :  { %v61_v4 = vpack.c.bf16 %v59_v2, %v58_v1  ;;  %v57_v5 = vld [vmem:[#allocation6 + $0x8] sm:$0xff]  ;;  %v53_v7 = vld [vmem:[#allocation3] sm:$0xff]  ;;  %v54_v8 = vld [vmem:[#allocation3 + $0x8] sm:$0xff]  ;;  %s133_s25 = sshll.u32 %s238_s24, 4  ;;  %s134_s25 = int_to_ptr.vmem [resolvable:$true] %s133_s25 }
  0x1f   :  { %v60_v6 = vpack.c.bf16 %v57_v5, %v56_v3  ;;  %v55_v9 = vpack.c.bf16 %v54_v8, %v53_v7  ;;  %v147_v18 = vld [vmem:[%s288_s2] ss:$0 sm:$0xff]  ;;  %s206_s26 = scalar_lea.vmem %s134_s25, 256  ;;  %p211_p11 = scmp.lt.s32.totalorder %s134_s25, %s134_s25 }
  0x20   :  { %152 = vmatpush3.bf16.msra.mxu0 %v61_v4  ;;  %p207_p10 = scmp.ne.s32.totalorder %s134_s25, %s206_s26  ;;  %p212_p12 = scmp.lt.s32.totalorder %s206_s26, %s206_s26 }
  0x21   :  { %153 = vmatprep.subr.bf16.mxu0 %v236_v0 }
  0x22   :  { %p213_p13 = por %p212_p12, %p211_p11 }
  0x24   :  { %154 = vmatpush3.bf16.msra.mxu0 %v60_v6  ;;  %v51_v10 = vld [vmem:[#allocation2] sm:$0xff]  ;;  %v52_v14 = vld [vmem:[#allocation2 + $0x8] sm:$0xff]  ;;  %p214_p0 = pnand %p213_p13, %p207_p10 }
  0x27   :  { %156 = vmatmul.mubr.msk.bf16.vlgmr.msra.gmra.mxu0 %vm62_vm2, %v55_v9 }
  0xe7   :  { %v100_v11 = vpop.f32.mrf.mxu0 }
  0xe8   :  { %v107_v12 = vadd.f32 %v100_v11, %v51_v10 }
  0xe9   :  { %v157_v13 = vpop.f32.mrf.mxu0 }
  0xea   :  { %110 = vst.msk [vmem:[#allocation2] sm:$0xff] %vm48_vm0, %v107_v12 }
  0xeb   :  { %v103_v15 = vpop.f32.mrf.mxu0 }
  0xec   :  { %v108_v16 = vadd.f32 %v103_v15, %v52_v14 }
  0xed   :  { %v158_v17 = vpop.f32.mrf.mxu0 }
  0xee   :  { %111 = vst.msk [vmem:[#allocation2 + $0x8] sm:$0xff] %vm48_vm0, %v108_v16 }
  0xf1   :  { %v115_v19 = vld [vmem:[#allocation2] sm:$0xff] }
  0xf2   :  { %v124_v20 = vadd.f32 %v147_v18, %v115_v19 }
  0xf4   :  { %126 = vst.msk [vmem:[#allocation8] sm:$0xff] %vm48_vm0, %v124_v20 }
  0xf5   :  { %v116_v21 = vld [vmem:[#allocation2 + $0x8] sm:$0xff] }
  0xf6   :  { %v125_v22 = vadd.f32 %v147_v18, %v116_v21 }
  0xf8   :  { %127 = vst.msk [vmem:[#allocation8 + $0x8] sm:$0xff] %vm48_vm0, %v125_v22 }
  0xf9   :  { %217 = shalt.err (!%p214_p0)
}
  0xfa   :  { %139 = dma.vmem_to_hbm [thread:$0]  %s134_s25, 256, %s289_s3, [#allocation5], %s233_s15, %s233_s15, %s234_s16  }
  0xfb   :  { %230 = dma.done.wait [#allocation5], 256  }
  0xfc   :  { %231 = vsyncadd [#allocation5], 4294967040 }
  0xfd   :  { %143 = vsyncpa [#allocation4], 1 }
  0xfe   :  { %144 = vsyncpa [#allocation7], 1 }
  0xff   :  { %145 = vsyncpa [#allocation5], 1 }

</bundles_post_ra>
